<compile_context>
chip_gen: v7x
topology: tpu7x:2x2x1
jax: 0.10.0
libtpu: 0.0.40
codegen_flags: <defaults>
</compile_context>

<pallas_src>
import functools

import jax
import jax.numpy as jnp
from jax.experimental import pallas as pl
from jax.experimental.pallas import tpu as pltpu

_LANE = 128
_ROW_ALIGN = 16  # bf16 sublane packing friendly (also a multiple of 8 for the f32 output)


def _round_up(x, m):
    return ((x + m - 1) // m) * m


# ---------------------------------------------------------------------------
# Device detection (perf-only heuristics; every code path is correct on every chip).
# ---------------------------------------------------------------------------
def _device_kind():
    try:
        return jax.devices()[0].device_kind.lower()
    except Exception:
        return ""


def _has_bf16_vpu():
    """v6e / v7x have a bf16 VALU -> run hidden-layer epilogues in bf16 there."""
    k = _device_kind()
    return ("v6" in k) or ("v7" in k) or ("7x" in k)


def _tensorcores_per_device():
    """v7x exposes 2 TensorCores per chip; the 'parallel' batch axis is sharded over them."""
    k = _device_kind()
    return 2 if (("v7" in k) or ("7x" in k)) else 1


# ---------------------------------------------------------------------------
# Kernel
# ---------------------------------------------------------------------------
def _make_mlp_kernel(hidden_bf16_epilogue):
    """Fused 5x (matmul + bias + ReLU) for one batch tile; all weights resident in VMEM.

    MXU operands are bf16 with f32 accumulation.  Hidden-layer epilogues are bf16 when
    `hidden_bf16_epilogue` (v6e/v7x), f32 otherwise; the final layer's epilogue is f32.
    """

    def kernel(x_ref,
               w1_ref, b1_ref, w2_ref, b2_ref, w3_ref, b3_ref,
               w4_ref, b4_ref, w5_ref, b5_ref, o_ref):
        def hidden(h_bf16, w_ref, b_ref):
            acc = jnp.dot(h_bf16, w_ref[...], preferred_element_type=jnp.float32)
            if hidden_bf16_epilogue:
                # bf16 bias-add + ReLU (b_ref is bf16); feeds the next matmul directly.
                return jnp.maximum(acc.astype(jnp.bfloat16) + b_ref[...], 0)
            # f32 epilogue (v5e: no bf16 VALU); cast once for the next matmul.
            return jnp.maximum(acc + b_ref[...], 0.0).astype(jnp.bfloat16)

        h = x_ref[...]                                   # bf16, features padded to 128
        h = hidden(h, w1_ref, b1_ref)
        h = hidden(h, w2_ref, b2_ref)
        h = hidden(h, w3_ref, b3_ref)
        h = hidden(h, w4_ref, b4_ref)
        # Final layer: accumulation + bias + ReLU stay in f32.
        acc = jnp.dot(h, w5_ref[...], preferred_element_type=jnp.float32)
        o_ref[...] = jnp.maximum(acc + b5_ref[...], 0.0).astype(o_ref.dtype)

    return kernel


# ---------------------------------------------------------------------------
# Parameter preparation (hoisted out of the per-call path)
# ---------------------------------------------------------------------------
def prepare_params(params, *, hidden_bf16=None):
    """One-time conversion of the 5 (W [in,out], b) f32 pairs for the fused kernel:
       * weights -> bf16 (MXU operand dtype); W1 zero-padded on the contraction
         (features) dim to a multiple of 128 (zero rows contribute nothing),
       * hidden-layer biases -> bf16 when the bf16 epilogue is used, else f32,
       * final-layer bias -> f32 (last epilogue always f32).
    Call once and reuse the result: avoids re-running the cast/pad XLA ops every call.
    """
    if hidden_bf16 is None:
        hidden_bf16 = _has_bf16_vpu()
    prepared = []
    last = len(params) - 1
    for li, (w, b) in enumerate(params):
        wb = jnp.asarray(w, jnp.bfloat16)
        if li == 0:
            f_in = wb.shape[0]
            f_pad = _round_up(f_in, _LANE)
            if f_pad != f_in:
                wb = jnp.pad(wb, ((0, f_pad - f_in), (0, 0)))
        b_dtype = jnp.float32 if (li == last or not hidden_bf16) else jnp.bfloat16
        bb = jnp.asarray(b, b_dtype).reshape(1, -1)
        prepared.append((wb, bb))
    return prepared, hidden_bf16


# ---------------------------------------------------------------------------
# Tiling policy
# ---------------------------------------------------------------------------
def _choose_tile_m(batch, n_cores):
    """Rows per grid step.  Up to 1024-row tiles; once the batch is split, keep at
    least ~4 steps so the pipeline hides DMAs; on 2-TC chips (v7x) force a split for
    batch >= 256 and keep the number of tiles a multiple of the core count so both
    TensorCores stay busy.  Single-core chips (v5e/v6e) keep one tile for small batches."""
    num_tiles = max(1, pl.cdiv(batch, 1024))
    if num_tiles > 1:
        num_tiles = max(num_tiles, min(4, pl.cdiv(batch, 512)))
    if n_cores > 1:
        if batch >= 256:
            num_tiles = max(num_tiles, n_cores)
        if num_tiles > 1:
            num_tiles = _round_up(num_tiles, n_cores)
    return _round_up(pl.cdiv(batch, num_tiles), _ROW_ALIGN)


# ---------------------------------------------------------------------------
# Forward
# ---------------------------------------------------------------------------
def base_reward_model_forward(x, prepared_params, *, hidden_bf16=None,
                              tile_m=None, out_dtype=jnp.float32):
    """x: [B, features].  prepared_params: output of prepare_params()."""
    if hidden_bf16 is None:
        hidden_bf16 = _has_bf16_vpu()
    B, F = x.shape
    F_pad = prepared_params[0][0].shape[0]          # padded contraction dim of layer 1
    n = prepared_params[0][0].shape[1]
    assert F <= F_pad, "params were prepared for a smaller feature dim"

    if tile_m is None:
        tile_m = _choose_tile_m(B, _tensorcores_per_device())
    tile_m = _round_up(int(tile_m), _ROW_ALIGN)
    if tile_m >= B:
        tile_m = B                                   # one block == full batch (any B is legal)
    grid_m = pl.cdiv(B, tile_m)

    # bf16 MXU operand; only the feature (contraction) dim is zero-padded.  The ragged
    # last batch tile is handled by Pallas's masked output store, so there is no batch
    # pad and no out[:B] slice (saves two extra HBM passes over the activations).
    xb = x.astype(jnp.bfloat16)
    if F_pad != F:
        xb = jnp.pad(xb, ((0, 0), (0, F_pad - F)))

    in_specs = [pl.BlockSpec((tile_m, F_pad), lambda i: (i, 0))]
    flat_params = []
    for (wb, bb) in prepared_params:
        in_specs.append(pl.BlockSpec(wb.shape, lambda i: (0, 0)))   # weights resident in VMEM
        in_specs.append(pl.BlockSpec(bb.shape, lambda i: (0, 0)))
        flat_params.extend([wb, bb])

    fn = pl.pallas_call(
        _make_mlp_kernel(hidden_bf16),
        out_shape=jax.ShapeDtypeStruct((B, n), out_dtype),
        grid_spec=pltpu.PrefetchScalarGridSpec(
            num_scalar_prefetch=0,
            grid=(grid_m,),
            in_specs=in_specs,
            out_specs=pl.BlockSpec((tile_m, n), lambda i: (i, 0)),
        ),
        compiler_params=pltpu.CompilerParams(
            dimension_semantics=("parallel",),
            vmem_limit_bytes=32 * 1024 * 1024,   # >= ~10 MiB worst-case working set (tile_m=1024)
        ),
    )
    return fn(xb, *flat_params)


# ---------------------------------------------------------------------------
# Reference / init / test
# ---------------------------------------------------------------------------
def init_params(key, features, n=256):
    """Deterministic init mirroring nn.Linear's U(-1/sqrt(fan_in), 1/sqrt(fan_in))."""
    dims = [(features, n), (n, n), (n, n), (n, n), (n, n)]
    params = []
    for (fan_in, fan_out) in dims:
        key, kw, kb = jax.random.split(key, 3)
        bound = 1.0 / jnp.sqrt(jnp.float32(fan_in))
        w = jax.random.uniform(kw, (fan_in, fan_out), jnp.float32, -bound, bound)
        b = jax.random.uniform(kb, (1, fan_out), jnp.float32, -bound, bound)
        params.append((w, b))
    return params


def reference_forward(x, params):
    h = x
    for (w, b) in params:
        h = jnp.maximum(h @ w + b, 0.0)
    return h


if __name__ == "__main__":
    key = jax.random.PRNGKey(0)
    kx, kp = jax.random.split(key)

    batch, features, n = 8, 32, 256
    x = jax.random.normal(kx, (batch, features), jnp.float32)
    params = init_params(kp, features, n)

    # One-time param conversion (cast/pad hoisted out of the per-call path).
    prepared, hidden_bf16 = prepare_params(params)

    fwd = jax.jit(functools.partial(base_reward_model_forward,
                                    hidden_bf16=hidden_bf16,
                                    out_dtype=jnp.float32))
    out = jax.block_until_ready(fwd(x, prepared))
    ref = reference_forward(x, params)

    assert out.shape == (batch, n)
    assert bool(jnp.all(jnp.isfinite(out)))
    # bf16 MXU operands / bf16 hidden epilogues with f32 final layer -> bf16-aware tolerance.
    max_err = float(jnp.max(jnp.abs(out - ref)))
    assert jnp.allclose(out, ref, atol=5e-2, rtol=5e-2), f"mismatch vs reference (max abs err {max_err})"

    print("KERNEL_OK")
</pallas_src>

<mosaic_0001>
module attributes {stable_mosaic.version = 11 : i64} {
  func.func @kernel(%arg0: i32, %arg1: memref<8x128xbf16, #tpu.memory_space<vmem>>, %arg2: memref<128x256xbf16, #tpu.memory_space<vmem>>, %arg3: memref<1x256xf32, #tpu.memory_space<vmem>>, %arg4: memref<256x256xbf16, #tpu.memory_space<vmem>>, %arg5: memref<1x256xf32, #tpu.memory_space<vmem>>, %arg6: memref<256x256xbf16, #tpu.memory_space<vmem>>, %arg7: memref<1x256xf32, #tpu.memory_space<vmem>>, %arg8: memref<256x256xbf16, #tpu.memory_space<vmem>>, %arg9: memref<1x256xf32, #tpu.memory_space<vmem>>, %arg10: memref<256x256xbf16, #tpu.memory_space<vmem>>, %arg11: memref<1x256xf32, #tpu.memory_space<vmem>>, %arg12: memref<8x256xf32, #tpu.memory_space<vmem>>) attributes {dimension_semantics = [#tpu.dimension_semantics<parallel>], iteration_bounds = array<i64: 1>, scalar_prefetch = 0 : i64, scratch_operands = 0 : i64, tpu.core_type = #tpu.core_type<tc>, window_params = [{transform_indices = @transform_0, window_bounds = array<i64: 8, 128>}, {pipeline_mode = #tpu.pipeline_mode<synchronous>, transform_indices = @transform_1, window_bounds = array<i64: 128, 256>}, {pipeline_mode = #tpu.pipeline_mode<synchronous>, transform_indices = @transform_2, window_bounds = array<i64: 1, 256>}, {pipeline_mode = #tpu.pipeline_mode<synchronous>, transform_indices = @transform_3, window_bounds = array<i64: 256, 256>}, {pipeline_mode = #tpu.pipeline_mode<synchronous>, transform_indices = @transform_4, window_bounds = array<i64: 1, 256>}, {pipeline_mode = #tpu.pipeline_mode<synchronous>, transform_indices = @transform_5, window_bounds = array<i64: 256, 256>}, {pipeline_mode = #tpu.pipeline_mode<synchronous>, transform_indices = @transform_6, window_bounds = array<i64: 1, 256>}, {pipeline_mode = #tpu.pipeline_mode<synchronous>, transform_indices = @transform_7, window_bounds = array<i64: 256, 256>}, {pipeline_mode = #tpu.pipeline_mode<synchronous>, transform_indices = @transform_8, window_bounds = array<i64: 1, 256>}, {pipeline_mode = #tpu.pipeline_mode<synchronous>, transform_indices = @transform_9, window_bounds = array<i64: 256, 256>}, {pipeline_mode = #tpu.pipeline_mode<synchronous>, transform_indices = @transform_10, window_bounds = array<i64: 1, 256>}, {transform_indices = @transform_11, window_bounds = array<i64: 8, 256>}]} {
    %c0 = arith.constant 0 : index
    %c0_0 = arith.constant 0 : index
    %0 = vector.load %arg1[%c0, %c0_0] : memref<8x128xbf16, #tpu.memory_space<vmem>>, vector<8x128xbf16>
    %c0_1 = arith.constant 0 : index
    %c0_2 = arith.constant 0 : index
    %1 = vector.load %arg2[%c0_1, %c0_2] : memref<128x256xbf16, #tpu.memory_space<vmem>>, vector<128x256xbf16>
    %cst = arith.constant dense<0.000000e+00> : vector<8x256xf32>
    %2 = tpu.matmul %0, %1, %cst {dimension_numbers = #tpu.dot_dimension_numbers<[1], [0], [0], [1], [0, 0, 1, 1], [], []>} : vector<8x128xbf16>, vector<128x256xbf16>, vector<8x256xf32> -> vector<8x256xf32>
    %c0_3 = arith.constant 0 : index
    %c0_4 = arith.constant 0 : index
    %3 = vector.load %arg3[%c0_3, %c0_4] : memref<1x256xf32, #tpu.memory_space<vmem>>, vector<1x256xf32>
    %4 = vector.broadcast %3 : vector<1x256xf32> to vector<8x256xf32>
    %5 = arith.addf %2, %4 : vector<8x256xf32>
    %cst_5 = arith.constant 0.000000e+00 : f32
    %6 = vector.broadcast %cst_5 : f32 to vector<8x256xf32>
    %7 = arith.maximumf %5, %6 : vector<8x256xf32>
    %8 = arith.truncf %7 : vector<8x256xf32> to vector<8x256xbf16>
    %c0_6 = arith.constant 0 : index
    %c0_7 = arith.constant 0 : index
    %9 = vector.load %arg4[%c0_6, %c0_7] : memref<256x256xbf16, #tpu.memory_space<vmem>>, vector<256x256xbf16>
    %cst_8 = arith.constant dense<0.000000e+00> : vector<8x256xf32>
    %10 = tpu.matmul %8, %9, %cst_8 {dimension_numbers = #tpu.dot_dimension_numbers<[1], [0], [0], [1], [0, 0, 1, 1], [], []>} : vector<8x256xbf16>, vector<256x256xbf16>, vector<8x256xf32> -> vector<8x256xf32>
    %c0_9 = arith.constant 0 : index
    %c0_10 = arith.constant 0 : index
    %11 = vector.load %arg5[%c0_9, %c0_10] : memref<1x256xf32, #tpu.memory_space<vmem>>, vector<1x256xf32>
    %12 = vector.broadcast %11 : vector<1x256xf32> to vector<8x256xf32>
    %13 = arith.addf %10, %12 : vector<8x256xf32>
    %cst_11 = arith.constant 0.000000e+00 : f32
    %14 = vector.broadcast %cst_11 : f32 to vector<8x256xf32>
    %15 = arith.maximumf %13, %14 : vector<8x256xf32>
    %16 = arith.truncf %15 : vector<8x256xf32> to vector<8x256xbf16>
    %c0_12 = arith.constant 0 : index
    %c0_13 = arith.constant 0 : index
    %17 = vector.load %arg6[%c0_12, %c0_13] : memref<256x256xbf16, #tpu.memory_space<vmem>>, vector<256x256xbf16>
    %cst_14 = arith.constant dense<0.000000e+00> : vector<8x256xf32>
    %18 = tpu.matmul %16, %17, %cst_14 {dimension_numbers = #tpu.dot_dimension_numbers<[1], [0], [0], [1], [0, 0, 1, 1], [], []>} : vector<8x256xbf16>, vector<256x256xbf16>, vector<8x256xf32> -> vector<8x256xf32>
    %c0_15 = arith.constant 0 : index
    %c0_16 = arith.constant 0 : index
    %19 = vector.load %arg7[%c0_15, %c0_16] : memref<1x256xf32, #tpu.memory_space<vmem>>, vector<1x256xf32>
    %20 = vector.broadcast %19 : vector<1x256xf32> to vector<8x256xf32>
    %21 = arith.addf %18, %20 : vector<8x256xf32>
    %cst_17 = arith.constant 0.000000e+00 : f32
    %22 = vector.broadcast %cst_17 : f32 to vector<8x256xf32>
    %23 = arith.maximumf %21, %22 : vector<8x256xf32>
    %24 = arith.truncf %23 : vector<8x256xf32> to vector<8x256xbf16>
    %c0_18 = arith.constant 0 : index
    %c0_19 = arith.constant 0 : index
    %25 = vector.load %arg8[%c0_18, %c0_19] : memref<256x256xbf16, #tpu.memory_space<vmem>>, vector<256x256xbf16>
    %cst_20 = arith.constant dense<0.000000e+00> : vector<8x256xf32>
    %26 = tpu.matmul %24, %25, %cst_20 {dimension_numbers = #tpu.dot_dimension_numbers<[1], [0], [0], [1], [0, 0, 1, 1], [], []>} : vector<8x256xbf16>, vector<256x256xbf16>, vector<8x256xf32> -> vector<8x256xf32>
    %c0_21 = arith.constant 0 : index
    %c0_22 = arith.constant 0 : index
    %27 = vector.load %arg9[%c0_21, %c0_22] : memref<1x256xf32, #tpu.memory_space<vmem>>, vector<1x256xf32>
    %28 = vector.broadcast %27 : vector<1x256xf32> to vector<8x256xf32>
    %29 = arith.addf %26, %28 : vector<8x256xf32>
    %cst_23 = arith.constant 0.000000e+00 : f32
    %30 = vector.broadcast %cst_23 : f32 to vector<8x256xf32>
    %31 = arith.maximumf %29, %30 : vector<8x256xf32>
    %32 = arith.truncf %31 : vector<8x256xf32> to vector<8x256xbf16>
    %c0_24 = arith.constant 0 : index
    %c0_25 = arith.constant 0 : index
    %33 = vector.load %arg10[%c0_24, %c0_25] : memref<256x256xbf16, #tpu.memory_space<vmem>>, vector<256x256xbf16>
    %cst_26 = arith.constant dense<0.000000e+00> : vector<8x256xf32>
    %34 = tpu.matmul %32, %33, %cst_26 {dimension_numbers = #tpu.dot_dimension_numbers<[1], [0], [0], [1], [0, 0, 1, 1], [], []>} : vector<8x256xbf16>, vector<256x256xbf16>, vector<8x256xf32> -> vector<8x256xf32>
    %c0_27 = arith.constant 0 : index
    %c0_28 = arith.constant 0 : index
    %35 = vector.load %arg11[%c0_27, %c0_28] : memref<1x256xf32, #tpu.memory_space<vmem>>, vector<1x256xf32>
    %36 = vector.broadcast %35 : vector<1x256xf32> to vector<8x256xf32>
    %37 = arith.addf %34, %36 : vector<8x256xf32>
    %cst_29 = arith.constant 0.000000e+00 : f32
    %38 = vector.broadcast %cst_29 : f32 to vector<8x256xf32>
    %39 = arith.maximumf %37, %38 : vector<8x256xf32>
    %c0_30 = arith.constant 0 : index
    %c0_31 = arith.constant 0 : index
    %40 = vector.load %arg12[%c0_30, %c0_31] : memref<8x256xf32, #tpu.memory_space<vmem>>, vector<8x256xf32>
    tpu.vector_store %arg12[%c0_30, %c0_31], %39 {strides = array<i32>} : memref<8x256xf32, #tpu.memory_space<vmem>>, vector<8x256xf32>,
    return
  }
  func.func @transform_0(%arg0: i32) -> (i32, i32) {
    %c0_i32 = arith.constant 0 : i32
    %c0_i32_0 = arith.constant 0 : i32
    return %arg0, %c0_i32 : i32, i32
  }
  func.func @transform_1(%arg0: i32) -> (i32, i32) {
    %c0_i32 = arith.constant 0 : i32
    %c0_i32_0 = arith.constant 0 : i32
    %c0_i32_1 = arith.constant 0 : i32
    return %c0_i32, %c0_i32_0 : i32, i32
  }
  func.func @transform_2(%arg0: i32) -> (i32, i32) {
    %c0_i32 = arith.constant 0 : i32
    %c0_i32_0 = arith.constant 0 : i32
    %c0_i32_1 = arith.constant 0 : i32
    return %c0_i32, %c0_i32_0 : i32, i32
  }
  func.func @transform_3(%arg0: i32) -> (i32, i32) {
    %c0_i32 = arith.constant 0 : i32
    %c0_i32_0 = arith.constant 0 : i32
    %c0_i32_1 = arith.constant 0 : i32
    return %c0_i32, %c0_i32_0 : i32, i32
  }
  func.func @transform_4(%arg0: i32) -> (i32, i32) {
    %c0_i32 = arith.constant 0 : i32
    %c0_i32_0 = arith.constant 0 : i32
    %c0_i32_1 = arith.constant 0 : i32
    return %c0_i32, %c0_i32_0 : i32, i32
  }
  func.func @transform_5(%arg0: i32) -> (i32, i32) {
    %c0_i32 = arith.constant 0 : i32
    %c0_i32_0 = arith.constant 0 : i32
    %c0_i32_1 = arith.constant 0 : i32
    return %c0_i32, %c0_i32_0 : i32, i32
  }
  func.func @transform_6(%arg0: i32) -> (i32, i32) {
    %c0_i32 = arith.constant 0 : i32
    %c0_i32_0 = arith.constant 0 : i32
    %c0_i32_1 = arith.constant 0 : i32
    return %c0_i32, %c0_i32_0 : i32, i32
  }
  func.func @transform_7(%arg0: i32) -> (i32, i32) {
    %c0_i32 = arith.constant 0 : i32
    %c0_i32_0 = arith.constant 0 : i32
    %c0_i32_1 = arith.constant 0 : i32
    return %c0_i32, %c0_i32_0 : i32, i32
  }
  func.func @transform_8(%arg0: i32) -> (i32, i32) {
    %c0_i32 = arith.constant 0 : i32
    %c0_i32_0 = arith.constant 0 : i32
    %c0_i32_1 = arith.constant 0 : i32
    return %c0_i32, %c0_i32_0 : i32, i32
  }
  func.func @transform_9(%arg0: i32) -> (i32, i32) {
    %c0_i32 = arith.constant 0 : i32
    %c0_i32_0 = arith.constant 0 : i32
    %c0_i32_1 = arith.constant 0 : i32
    return %c0_i32, %c0_i32_0 : i32, i32
  }
  func.func @transform_10(%arg0: i32) -> (i32, i32) {
    %c0_i32 = arith.constant 0 : i32
    %c0_i32_0 = arith.constant 0 : i32
    %c0_i32_1 = arith.constant 0 : i32
    return %c0_i32, %c0_i32_0 : i32, i32
  }
  func.func @transform_11(%arg0: i32) -> (i32, i32) {
    %c0_i32 = arith.constant 0 : i32
    %c0_i32_0 = arith.constant 0 : i32
    return %arg0, %c0_i32 : i32, i32
  }
}

</mosaic_0001>

<bundles_post_ra>
// kernel: base_reward_model_forward.1
= control target key start
LH: loop header
LB: loop body
LE: loop exit
PB: predicated region body
PF: predicated region fallthrough
CT: control target
= control target key end

     0   :  { %16 = vsyncpa [#allocation3], 0  ;;  %s1986_s0 = inlined_call_operand.vmem [shape: bf16[8,128], index: 0, kind: input, shape index: {}]   ;;  %s1987_s1 = inlined_call_operand.hbm [shape: bf16[128,256], index: 1, kind: input, shape index: {}]   ;;  %s1988_s2 = inlined_call_operand.vmem [shape: f32[1,256], index: 2, kind: input, shape index: {}]   ;;  %s1989_s3 = inlined_call_operand.hbm [shape: bf16[256,256], index: 3, kind: input, shape index: {}]   ;;  %s1990_s4 = inlined_call_operand.vmem [shape: f32[1,256], index: 4, kind: input, shape index: {}]   ;;  %s1991_s5 = inlined_call_operand.hbm [shape: bf16[256,256], index: 5, kind: input, shape index: {}]   ;;  %s1992_s6 = inlined_call_operand.vmem [shape: f32[1,256], index: 6, kind: input, shape index: {}]   ;;  %s1993_s7 = inlined_call_operand.hbm [shape: bf16[256,256], index: 7, kind: input, shape index: {}]   ;;  %s1994_s8 = inlined_call_operand.vmem [shape: f32[1,256], index: 8, kind: input, shape index: {}]   ;;  %s1995_s9 = inlined_call_operand.hbm [shape: bf16[256,256], index: 9, kind: input, shape index: {}]   ;;  %s1996_s10 = inlined_call_operand.vmem [shape: f32[1,256], index: 10, kind: input, shape index: {}]   ;;  %s1997_s11 = inlined_call_operand.hbm [shape: f32[8,256], index: 11, kind: output, shape index: {}]  }
   0x1   :  { %17 = vsyncpa [#allocation6], 0 }
   0x2   :  { %18 = vsyncpa [#allocation9], 0 }
   0x3   :  { %19 = vsyncpa [#allocation4], 0  ;;  %s1784_s17 = smov [#allocation5]   ;;  %s1785_s19 = smov [#allocation8]  }
   0x4   :  { %s41_s18 = sshll.u32 %s1784_s17, 4  ;;  %s69_s20 = sshll.u32 %s1785_s19, 4  ;;  %s42_s18 = int_to_ptr.vmem [resolvable:$true] %s41_s18  ;;  %s1853_s20 = int_to_ptr.vmem [resolvable:$true] %s69_s20 }
   0x5   :  { %s1644_s23 = scalar_lea.hbm %s1989_s3, 4096 }
   0x6   :  { %p1645_p0 = scmp.ne.s32.totalorder %s1989_s3, %s1644_s23  ;;  %p1648_p1 = scmp.lt.u32.totalorder %s1644_s23, %s1989_s3 }
   0x8   :  { %p1650_p2 = pnand %p1648_p1, %p1645_p0 }
   0xa   :  { %1653 = shalt.err (!%p1650_p2)
}
   0xb   :  { %s1654_s28 = scalar_lea.vmem %s42_s18, 4096  ;;  %p1659_p4 = scmp.lt.s32.totalorder %s42_s18, %s42_s18 }
   0xc   :  { %p1655_p3 = scmp.ne.s32.totalorder %s42_s18, %s1654_s28  ;;  %p1660_p5 = scmp.lt.s32.totalorder %s1654_s28, %s1654_s28 }
   0xe   :  { %p1661_p6 = por %p1660_p5, %p1659_p4 }
  0x10   :  { %p1662_p7 = pnand %p1661_p6, %p1655_p3 }
  0x12   :  { %1665 = shalt.err (!%p1662_p7)
}
  0x13   :  { %s1786_s29 = smov 128   ;;  %s1787_s30 = smov 8  }
  0x14   :  { %47 = dma.hbm_to_vmem [thread:$0]  %s1989_s3, 4096, %s42_s18, [#allocation6], %s1786_s29, %s1786_s29, %s1787_s30  }
  0x15   :  { %s1666_s16 = scalar_lea.hbm %s1993_s7, 4096 }
  0x16   :  { %p1667_p8 = scmp.ne.s32.totalorder %s1993_s7, %s1666_s16  ;;  %p1670_p9 = scmp.lt.u32.totalorder %s1666_s16, %s1993_s7 }
  0x18   :  { %p1672_p10 = pnand %p1670_p9, %p1667_p8 }
  0x1a   :  { %1675 = shalt.err (!%p1672_p10)
}
  0x1b   :  { %s1676_s23 = scalar_lea.vmem %s1853_s20, 4096  ;;  %p1681_p12 = scmp.lt.s32.totalorder %s1853_s20, %s1853_s20 }
  0x1c   :  { %p1677_p11 = scmp.ne.s32.totalorder %s1853_s20, %s1676_s23  ;;  %p1682_p13 = scmp.lt.s32.totalorder %s1676_s23, %s1676_s23 }
  0x1e   :  { %p1683_p0 = por %p1682_p13, %p1681_p12 }
  0x20   :  { %p1684_p1 = pnand %p1683_p0, %p1677_p11 }
  0x22   :  { %1687 = shalt.err (!%p1684_p1)
}
  0x23   :  { %75 = dma.hbm_to_vmem [thread:$0]  %s1993_s7, 4096, %s1853_s20, [#allocation9], %s1786_s29, %s1786_s29, %s1787_s30  }
  0x24   :  { %s1788_s24 = smov [#allocation2]   ;;  %s1789_s26 = smov [#allocation7]  }
  0x25   :  { %s27_s25 = sshll.u32 %s1788_s24, 4  ;;  %s55_s27 = sshll.u32 %s1789_s26, 4  ;;  %s28_s25 = int_to_ptr.vmem [resolvable:$true] %s27_s25  ;;  %s1890_s27 = int_to_ptr.vmem [resolvable:$true] %s55_s27 }
  0x26   :  { %s1688_s13 = scalar_lea.hbm %s1987_s1, 2048 }
  0x27   :  { %p1689_p2 = scmp.ne.s32.totalorder %s1987_s1, %s1688_s13  ;;  %p1692_p3 = scmp.lt.u32.totalorder %s1688_s13, %s1987_s1 }
  0x29   :  { %p1694_p4 = pnand %p1692_p3, %p1689_p2 }
  0x2b   :  { %1697 = shalt.err (!%p1694_p4)
}
  0x2c   :  { %s1698_s7 = scalar_lea.vmem %s28_s25, 2048  ;;  %p1703_p6 = scmp.lt.s32.totalorder %s28_s25, %s28_s25 }
  0x2d   :  { %p1699_p5 = scmp.ne.s32.totalorder %s28_s25, %s1698_s7  ;;  %p1704_p7 = scmp.lt.s32.totalorder %s1698_s7, %s1698_s7 }
  0x2f   :  { %p1705_p8 = por %p1704_p7, %p1703_p6 }
  0x31   :  { %p1706_p9 = pnand %p1705_p8, %p1699_p5 }
  0x33   :  { %1709 = shalt.err (!%p1706_p9)
}
  0x34   :  { %33 = dma.hbm_to_vmem [thread:$0]  %s1987_s1, 2048, %s28_s25, [#allocation3], %s1786_s29, %s1786_s29, %s1787_s30  }
  0x35   :  { %s1710_s23 = scalar_lea.hbm %s1991_s5, 4096 }
  0x36   :  { %p1711_p10 = scmp.ne.s32.totalorder %s1991_s5, %s1710_s23  ;;  %p1714_p11 = scmp.lt.u32.totalorder %s1710_s23, %s1991_s5 }
  0x38   :  { %p1716_p12 = pnand %p1714_p11, %p1711_p10 }
  0x3a   :  { %1719 = shalt.err (!%p1716_p12)
}
  0x3b   :  { %s1720_s28 = scalar_lea.vmem %s1890_s27, 4096  ;;  %p1725_p0 = scmp.lt.s32.totalorder %s1890_s27, %s1890_s27 }
  0x3c   :  { %p1721_p13 = scmp.ne.s32.totalorder %s1890_s27, %s1720_s28  ;;  %p1726_p1 = scmp.lt.s32.totalorder %s1720_s28, %s1720_s28 }
  0x3e   :  { %p1727_p2 = por %p1726_p1, %p1725_p0 }
  0x40   :  { %p1728_p3 = pnand %p1727_p2, %p1721_p13 }
  0x42   :  { %1731 = shalt.err (!%p1728_p3)
}
  0x43   :  { %61 = dma.hbm_to_vmem [thread:$0]  %s1991_s5, 4096, %s1890_s27, [#allocation6], %s1786_s29, %s1786_s29, %s1787_s30  }
  0x44   :  { %s1790_s12 = smov [#allocation10]   ;;  %s1732_s16 = scalar_lea.hbm %s1995_s9, 4096 }
  0x45   :  { %s83_s13 = sshll.u32 %s1790_s12, 4  ;;  %p1733_p4 = scmp.ne.s32.totalorder %s1995_s9, %s1732_s16  ;;  %s84_s13 = int_to_ptr.vmem [resolvable:$true] %s83_s13 }
  0x46   :  { %p1736_p5 = scmp.lt.u32.totalorder %s1732_s16, %s1995_s9 }
  0x48   :  { %p1738_p6 = pnand %p1736_p5, %p1733_p4 }
  0x4a   :  { %1741 = shalt.err (!%p1738_p6)
}
  0x4b   :  { %s1742_s21 = scalar_lea.vmem %s84_s13, 4096  ;;  %p1747_p8 = scmp.lt.s32.totalorder %s84_s13, %s84_s13 }
  0x4c   :  { %p1743_p7 = scmp.ne.s32.totalorder %s84_s13, %s1742_s21  ;;  %p1748_p9 = scmp.lt.s32.totalorder %s1742_s21, %s1742_s21 }
  0x4e   :  { %p1749_p10 = por %p1748_p9, %p1747_p8 }
  0x50   :  { %p1750_p11 = pnand %p1749_p10, %p1743_p7 }
  0x52   :  { %1753 = shalt.err (!%p1750_p11)
}
  0x53   :  { %89 = dma.hbm_to_vmem [thread:$0]  %s1995_s9, 4096, %s84_s13, [#allocation9], %s1786_s29, %s1786_s29, %s1787_s30  }
  0x54   :  { %1776 = dma.done.wait [#allocation3], 2048  }
  0x55   :  { %1777 = vsyncadd [#allocation3], 4294965248 }
  0x56   :  { %1778 = dma.done.wait [#allocation6], 8192  }
  0x57   :  { %1779 = vsyncadd [#allocation6], 4294959104 }
  0x58   :  { %1780 = dma.done.wait [#allocation9], 8192  }
  0x59   :  { %1781 = vsyncadd [#allocation9], 4294959104  ;;  %v1791_v0 = vmov 0   ;;  %v1428_v1 = vld [vmem:[#allocation2 + $0x4] ss:$8 sps:$4 sm:$0xff]  }
  0x5a   :  { %249 = vmatprep.mubr.bf16.mxu0 %v1791_v0  ;;  %v1430_v2 = vld [vmem:[#allocation2] ss:$8 sps:$4 sm:$0xff]   ;;  %217 = vmatprep.subr.bf16.mxu0 %v1428_v1  ;;  %v1431_v3 = vld [vmem:[#allocation2 + $0x14] ss:$8 sps:$4 sm:$0xff]   ;;  %v1433_v4 = vld [vmem:[#allocation2 + $0x10] ss:$8 sps:$4 sm:$0xff]  }
  0x5b   :  { %218 = vmatpush1.bf16.msra.mxu0 %v1430_v2  ;;  %v1434_v5 = vld [vmem:[#allocation2 + $0x24] ss:$8 sps:$4 sm:$0xff]   ;;  %v1436_v6 = vld [vmem:[#allocation2 + $0x20] ss:$8 sps:$4 sm:$0xff]   ;;  %v1437_v7 = vld [vmem:[#allocation2 + $0x34] ss:$8 sps:$4 sm:$0xff]  }
  0x5c   :  { %219 = vmatprep.subr.bf16.mxu0 %v1431_v3  ;;  %v1439_v8 = vld [vmem:[#allocation2 + $0x30] ss:$8 sps:$4 sm:$0xff]   ;;  %v1440_v9 = vld [vmem:[#allocation2 + $0x44] ss:$8 sps:$4 sm:$0xff]   ;;  %v1454_v11 = vld [vmem:[#allocation5] ss:$8 sps:$4 sm:$0xff]  }
  0x5d   :  { %v1452_v10 = vld [vmem:[#allocation5 + $0x4] ss:$8 sps:$4 sm:$0xff]   ;;  %v1455_v12 = vld [vmem:[#allocation5 + $0x14] ss:$8 sps:$4 sm:$0xff]   ;;  %v1442_v13 = vld [vmem:[#allocation2 + $0x40] ss:$8 sps:$4 sm:$0xff]  }
  0x5e   :  { %466 = vmatprep.subr.bf16.mxu1 %v1452_v10  ;;  %v1457_v14 = vld [vmem:[#allocation5 + $0x10] ss:$8 sps:$4 sm:$0xff]   ;;  %v1458_v15 = vld [vmem:[#allocation5 + $0x24] ss:$8 sps:$4 sm:$0xff]   ;;  %v1443_v16 = vld [vmem:[#allocation2 + $0x54] ss:$8 sps:$4 sm:$0xff]  }
  0x5f   :  { %220 = vmatpush1.bf16.msra.mxu0 %v1433_v4  ;;  %467 = vmatpush1.bf16.msra.mxu1 %v1454_v11  ;;  %v1445_v17 = vld [vmem:[#allocation2 + $0x50] ss:$8 sps:$4 sm:$0xff]   ;;  %v1460_v18 = vld [vmem:[#allocation5 + $0x20] ss:$8 sps:$4 sm:$0xff]   ;;  %v1461_v19 = vld [vmem:[#allocation5 + $0x34] ss:$8 sps:$4 sm:$0xff]  }
  0x60   :  { %221 = vmatprep.subr.bf16.mxu0 %v1434_v5  ;;  %468 = vmatprep.subr.bf16.mxu1 %v1455_v12  ;;  %v1446_v20 = vld [vmem:[#allocation2 + $0x64] ss:$8 sps:$4 sm:$0xff]   ;;  %v1448_v21 = vld [vmem:[#allocation2 + $0x60] ss:$8 sps:$4 sm:$0xff]   ;;  %v1463_v22 = vld [vmem:[#allocation5 + $0x30] ss:$8 sps:$4 sm:$0xff]  }
  0x61   :  { %v1464_v23 = vld [vmem:[#allocation5 + $0x44] ss:$8 sps:$4 sm:$0xff]   ;;  %v1449_v24 = vld [vmem:[#allocation2 + $0x74] ss:$8 sps:$4 sm:$0xff]   ;;  %v1451_v25 = vld [vmem:[#allocation2 + $0x70] ss:$8 sps:$4 sm:$0xff]  }
  0x62   :  { %v1466_v26 = vld [vmem:[#allocation5 + $0x40] ss:$8 sps:$4 sm:$0xff]   ;;  %v1467_v27 = vld [vmem:[#allocation5 + $0x54] ss:$8 sps:$4 sm:$0xff]   ;;  %v1469_v29 = vld [vmem:[#allocation5 + $0x50] ss:$8 sps:$4 sm:$0xff]  }
  0x63   :  { %222 = vmatpush1.bf16.msra.mxu0 %v1436_v6  ;;  %469 = vmatpush1.bf16.msra.mxu1 %v1457_v14  ;;  %v108_v28 = vld [vmem:[%s1986_s0] sm:$0xf]  ;;  %v1470_v30 = vld [vmem:[#allocation5 + $0x64] ss:$8 sps:$4 sm:$0xff]   ;;  %v1473_v32 = vld [vmem:[#allocation5 + $0x74] ss:$8 sps:$4 sm:$0xff]   ;;  %v127_v14 = vlaneseq }
  0x64   :  { %223 = vmatprep.subr.bf16.mxu0 %v1437_v7  ;;  %470 = vmatprep.subr.bf16.mxu1 %v1458_v15  ;;  %v1472_v31 = vld [vmem:[#allocation5 + $0x60] ss:$8 sps:$4 sm:$0xff]   ;;  %v1475_v33 = vld [vmem:[#allocation5 + $0x70] ss:$8 sps:$4 sm:$0xff]   ;;  %v1476_v34 = vld [vmem:[#allocation5 + $0x84] ss:$8 sps:$4 sm:$0xff]  }
  0x65   :  { %v1478_v35 = vld [vmem:[#allocation5 + $0x80] ss:$8 sps:$4 sm:$0xff]   ;;  %v1479_v36 = vld [vmem:[#allocation5 + $0x94] ss:$8 sps:$4 sm:$0xff]   ;;  %v1481_v37 = vld [vmem:[#allocation5 + $0x90] ss:$8 sps:$4 sm:$0xff]  }
  0x66   :  { %v1482_v38 = vld [vmem:[#allocation5 + $0xa4] ss:$8 sps:$4 sm:$0xff]   ;;  %v1484_v39 = vld [vmem:[#allocation5 + $0xa0] ss:$8 sps:$4 sm:$0xff]   ;;  %v1485_v40 = vld [vmem:[#allocation5 + $0xb4] ss:$8 sps:$4 sm:$0xff]  }
  0x67   :  { %224 = vmatpush1.bf16.msra.mxu0 %v1439_v8  ;;  %471 = vmatpush1.bf16.msra.mxu1 %v1460_v18  ;;  %v1487_v41 = vld [vmem:[#allocation5 + $0xb0] ss:$8 sps:$4 sm:$0xff]   ;;  %v1488_v42 = vld [vmem:[#allocation5 + $0xc4] ss:$8 sps:$4 sm:$0xff]   ;;  %v1490_v43 = vld [vmem:[#allocation5 + $0xc0] ss:$8 sps:$4 sm:$0xff]  }
  0x68   :  { %225 = vmatprep.subr.bf16.mxu0 %v1440_v9  ;;  %472 = vmatprep.subr.bf16.mxu1 %v1461_v19  ;;  %v1491_v44 = vld [vmem:[#allocation5 + $0xd4] ss:$8 sps:$4 sm:$0xff]   ;;  %v1493_v45 = vld [vmem:[#allocation5 + $0xd0] ss:$8 sps:$4 sm:$0xff]   ;;  %v1494_v46 = vld [vmem:[#allocation5 + $0xe4] ss:$8 sps:$4 sm:$0xff]  }
  0x69   :  { %v1496_v47 = vld [vmem:[#allocation5 + $0xe0] ss:$8 sps:$4 sm:$0xff]   ;;  %v1497_v48 = vld [vmem:[#allocation5 + $0xf4] ss:$8 sps:$4 sm:$0xff]   ;;  %v1499_v49 = vld [vmem:[#allocation5 + $0xf0] ss:$8 sps:$4 sm:$0xff]  }
  0x6a   :  { %v1500_v50 = vld [vmem:[#allocation7] ss:$8 sps:$4 sm:$0xff]   ;;  %v1502_v51 = vld [vmem:[#allocation7 + $0x4] ss:$8 sps:$4 sm:$0xff]   ;;  %v1505_v52 = vld [vmem:[#allocation7 + $0x14] ss:$8 sps:$4 sm:$0xff]  }
  0x6b   :  { %226 = vmatpush1.bf16.msra.mxu0 %v1442_v13  ;;  %473 = vmatpush1.bf16.msra.mxu1 %v1463_v22  ;;  %v1503_v53 = vld [vmem:[#allocation7 + $0x10] ss:$8 sps:$4 sm:$0xff]   ;;  %v1508_v54 = vld [vmem:[#allocation7 + $0x24] ss:$8 sps:$4 sm:$0xff]   ;;  %v1506_v55 = vld [vmem:[#allocation7 + $0x20] ss:$8 sps:$4 sm:$0xff]  }
  0x6c   :  { %227 = vmatprep.subr.bf16.mxu0 %v1443_v16  ;;  %474 = vmatprep.subr.bf16.mxu1 %v1464_v23  ;;  %v1511_v56 = vld [vmem:[#allocation7 + $0x34] ss:$8 sps:$4 sm:$0xff]   ;;  %v1509_v57 = vld [vmem:[#allocation7 + $0x30] ss:$8 sps:$4 sm:$0xff]   ;;  %v1514_v58 = vld [vmem:[#allocation7 + $0x44] ss:$8 sps:$4 sm:$0xff]  }
  0x6d   :  { %v1512_v59 = vld [vmem:[#allocation7 + $0x40] ss:$8 sps:$4 sm:$0xff]   ;;  %v1517_v60 = vld [vmem:[#allocation7 + $0x54] ss:$8 sps:$4 sm:$0xff]   ;;  %v1515_v61 = vld [vmem:[#allocation7 + $0x50] ss:$8 sps:$4 sm:$0xff]  }
  0x6e   :  { %v1520_v62 = vld [vmem:[#allocation7 + $0x64] ss:$8 sps:$4 sm:$0xff]   ;;  %v1518_v63 = vld [vmem:[#allocation7 + $0x60] ss:$8 sps:$4 sm:$0xff]   ;;  %v1523_v0 = vld [vmem:[#allocation7 + $0x74] ss:$8 sps:$4 sm:$0xff]  }
  0x6f   :  { %228 = vmatpush1.bf16.msra.mxu0 %v1445_v17  ;;  %475 = vmatpush1.bf16.msra.mxu1 %v1466_v26  ;;  %v1521_v1 = vld [vmem:[#allocation7 + $0x70] ss:$8 sps:$4 sm:$0xff]   ;;  %v1526_v2 = vld [vmem:[#allocation7 + $0x84] ss:$8 sps:$4 sm:$0xff]   ;;  %v1524_v3 = vld [vmem:[#allocation7 + $0x80] ss:$8 sps:$4 sm:$0xff]  }
  0x70   :  { %229 = vmatprep.subr.bf16.mxu0 %v1446_v20  ;;  %476 = vmatprep.subr.bf16.mxu1 %v1467_v27  ;;  %v1529_v4 = vld [vmem:[#allocation7 + $0x94] ss:$8 sps:$4 sm:$0xff]   ;;  %v1527_v5 = vld [vmem:[#allocation7 + $0x90] ss:$8 sps:$4 sm:$0xff]   ;;  %v1532_v6 = vld [vmem:[#allocation7 + $0xa4] ss:$8 sps:$4 sm:$0xff]  }
  0x71   :  { %v1530_v7 = vld [vmem:[#allocation7 + $0xa0] ss:$8 sps:$4 sm:$0xff]   ;;  %v1535_v8 = vld [vmem:[#allocation7 + $0xb4] ss:$8 sps:$4 sm:$0xff]   ;;  %v1533_v9 = vld [vmem:[#allocation7 + $0xb0] ss:$8 sps:$4 sm:$0xff]  }
  0x72   :  { %v1538_v10 = vld [vmem:[#allocation7 + $0xc4] ss:$8 sps:$4 sm:$0xff]   ;;  %v1536_v11 = vld [vmem:[#allocation7 + $0xc0] ss:$8 sps:$4 sm:$0xff]   ;;  %v1541_v12 = vld [vmem:[#allocation7 + $0xd4] ss:$8 sps:$4 sm:$0xff]  }
  0x73   :  { %230 = vmatpush1.bf16.msra.mxu0 %v1448_v21  ;;  %477 = vmatpush1.bf16.msra.mxu1 %v1469_v29  ;;  %v1539_v13 = vld [vmem:[#allocation7 + $0xd0] ss:$8 sps:$4 sm:$0xff]   ;;  %v128_v15 = vshrl.u32 %v127_v14, 7  ;;  %v125_v17 = vld [vmem:[%s1988_s2] sm:$0x3] }
  0x74   :  { %231 = vmatprep.subr.bf16.mxu0 %v1449_v24  ;;  %478 = vmatprep.subr.bf16.mxu1 %v1470_v30  ;;  %v1595_v14 = vld [vmem:[#allocation8 + $0xf4] ss:$8 sps:$4 sm:$0xff]  }
  0x75   :  { %v1945_v16 = vsub.s32 0, %v128_v15  ;;  %v1950_v18 = vsub.s32 1, %v128_v15  ;;  %v1593_v15 = vld [vmem:[#allocation8 + $0xf0] ss:$8 sps:$4 sm:$0xff]  }
  0x77   :  { %232 = vmatpush1.bf16.msra.mxu0 %v1451_v25  ;;  %479 = vmatpush1.bf16.msra.mxu1 %v1472_v31  ;;  %v130_v19 = vrot.slane %v125_v17, %v1945_v16  ;;  %v134_v20 = vrot.slane %v125_v17, %v1950_v18  ;;  %v1544_v31 = vld [vmem:[#allocation7 + $0xe4] ss:$8 sps:$4 sm:$0xff]   ;;  %v1596_v17 = vld [vmem:[#allocation10] ss:$8 sps:$4 sm:$0xff]  }
  0x78   :  { %480 = vmatprep.subr.bf16.mxu1 %v1473_v32  ;;  %715 = vmatprep.subr.bf16.mxu0 %v1502_v51  ;;  %v1542_v32 = vld [vmem:[#allocation7 + $0xe0] ss:$8 sps:$4 sm:$0xff]   ;;  %v1574_v51 = vld [vmem:[#allocation8 + $0x84] ss:$8 sps:$4 sm:$0xff]  }
  0x7a   :  { %250 = vmatmul.mubr.bf16.vlgmr.msra.gmra.mrb[0].mxu0 %v108_v28 }
  0x7b   :  { %481 = vmatpush1.bf16.msra.mxu1 %v1475_v33  ;;  %716 = vmatpush1.bf16.msra.mxu0 %v1500_v50  ;;  %v1547_v33 = vld [vmem:[#allocation7 + $0xf4] ss:$8 sps:$4 sm:$0xff]   ;;  %v1569_v50 = vld [vmem:[#allocation8 + $0x70] ss:$8 sps:$4 sm:$0xff]  }
  0x7c   :  { %482 = vmatprep.subr.bf16.mxu1 %v1476_v34  ;;  %717 = vmatprep.subr.bf16.mxu0 %v1505_v52  ;;  %v1545_v34 = vld [vmem:[#allocation7 + $0xf0] ss:$8 sps:$4 sm:$0xff]   ;;  %v1572_v52 = vld [vmem:[#allocation8 + $0x80] ss:$8 sps:$4 sm:$0xff]  }
  0x7f   :  { %483 = vmatpush1.bf16.msra.mxu1 %v1478_v35  ;;  %718 = vmatpush1.bf16.msra.mxu0 %v1503_v53  ;;  %v1548_v35 = vld [vmem:[#allocation8] ss:$8 sps:$4 sm:$0xff]   ;;  %v1577_v53 = vld [vmem:[#allocation8 + $0x94] ss:$8 sps:$4 sm:$0xff]  }
  0x80   :  { %484 = vmatprep.subr.bf16.mxu1 %v1479_v36  ;;  %719 = vmatprep.subr.bf16.mxu0 %v1508_v54  ;;  %v1550_v36 = vld [vmem:[#allocation8 + $0x4] ss:$8 sps:$4 sm:$0xff]   ;;  %v1575_v54 = vld [vmem:[#allocation8 + $0x90] ss:$8 sps:$4 sm:$0xff]  }
  0x83   :  { %485 = vmatpush1.bf16.msra.mxu1 %v1481_v37  ;;  %720 = vmatpush1.bf16.msra.mxu0 %v1506_v55  ;;  %v1553_v37 = vld [vmem:[#allocation8 + $0x14] ss:$8 sps:$4 sm:$0xff]   ;;  %v1580_v55 = vld [vmem:[#allocation8 + $0xa4] ss:$8 sps:$4 sm:$0xff]  }
  0x84   :  { %486 = vmatprep.subr.bf16.mxu1 %v1482_v38  ;;  %721 = vmatprep.subr.bf16.mxu0 %v1511_v56  ;;  %v1551_v38 = vld [vmem:[#allocation8 + $0x10] ss:$8 sps:$4 sm:$0xff]   ;;  %v1578_v56 = vld [vmem:[#allocation8 + $0xa0] ss:$8 sps:$4 sm:$0xff]  }
  0x87   :  { %487 = vmatpush1.bf16.msra.mxu1 %v1484_v39  ;;  %722 = vmatpush1.bf16.msra.mxu0 %v1509_v57  ;;  %v1556_v39 = vld [vmem:[#allocation8 + $0x24] ss:$8 sps:$4 sm:$0xff]   ;;  %v1583_v57 = vld [vmem:[#allocation8 + $0xb4] ss:$8 sps:$4 sm:$0xff]  }
  0x88   :  { %488 = vmatprep.subr.bf16.mxu1 %v1485_v40  ;;  %723 = vmatprep.subr.bf16.mxu0 %v1514_v58  ;;  %v1554_v40 = vld [vmem:[#allocation8 + $0x20] ss:$8 sps:$4 sm:$0xff]   ;;  %v1581_v58 = vld [vmem:[#allocation8 + $0xb0] ss:$8 sps:$4 sm:$0xff]  }
  0x8b   :  { %489 = vmatpush1.bf16.msra.mxu1 %v1487_v41  ;;  %724 = vmatpush1.bf16.msra.mxu0 %v1512_v59  ;;  %v1559_v41 = vld [vmem:[#allocation8 + $0x34] ss:$8 sps:$4 sm:$0xff]   ;;  %v1586_v59 = vld [vmem:[#allocation8 + $0xc4] ss:$8 sps:$4 sm:$0xff]  }
  0x8c   :  { %490 = vmatprep.subr.bf16.mxu1 %v1488_v42  ;;  %725 = vmatprep.subr.bf16.mxu0 %v1517_v60  ;;  %v1557_v42 = vld [vmem:[#allocation8 + $0x30] ss:$8 sps:$4 sm:$0xff]   ;;  %v1584_v60 = vld [vmem:[#allocation8 + $0xc0] ss:$8 sps:$4 sm:$0xff]  }
  0x8f   :  { %491 = vmatpush1.bf16.msra.mxu1 %v1490_v43  ;;  %726 = vmatpush1.bf16.msra.mxu0 %v1515_v61  ;;  %v1562_v43 = vld [vmem:[#allocation8 + $0x44] ss:$8 sps:$4 sm:$0xff]   ;;  %v1589_v61 = vld [vmem:[#allocation8 + $0xd4] ss:$8 sps:$4 sm:$0xff]  }
  0x90   :  { %492 = vmatprep.subr.bf16.mxu1 %v1491_v44  ;;  %727 = vmatprep.subr.bf16.mxu0 %v1520_v62  ;;  %v1560_v44 = vld [vmem:[#allocation8 + $0x40] ss:$8 sps:$4 sm:$0xff]   ;;  %v1587_v62 = vld [vmem:[#allocation8 + $0xd0] ss:$8 sps:$4 sm:$0xff]  }
  0x93   :  { %493 = vmatpush1.bf16.msra.mxu1 %v1493_v45  ;;  %728 = vmatpush1.bf16.msra.mxu0 %v1518_v63  ;;  %v1565_v45 = vld [vmem:[#allocation8 + $0x54] ss:$8 sps:$4 sm:$0xff]   ;;  %v294_v63 = vld [vmem:[%s1990_s4] sm:$0x3] }
  0x94   :  { %494 = vmatprep.subr.bf16.mxu1 %v1494_v46  ;;  %729 = vmatprep.subr.bf16.mxu0 %v1523_v0  ;;  %v1563_v46 = vld [vmem:[#allocation8 + $0x50] ss:$8 sps:$4 sm:$0xff]   ;;  %v299_v0 = vrot.slane %v294_v63, %v1945_v16 }
  0x97   :  { %495 = vmatpush1.bf16.msra.mxu1 %v1496_v47  ;;  %730 = vmatpush1.bf16.msra.mxu0 %v1521_v1  ;;  %v1568_v47 = vld [vmem:[#allocation8 + $0x64] ss:$8 sps:$4 sm:$0xff]   ;;  %v303_v1 = vrot.slane %v294_v63, %v1950_v18  ;;  %v792_v63 = vld [vmem:[%s1994_s8] sm:$0x3]  ;;  %s1792_s8 = smov [#allocation11]  }
  0x98   :  { %496 = vmatprep.subr.bf16.mxu1 %v1497_v48  ;;  %731 = vmatprep.subr.bf16.mxu0 %v1526_v2  ;;  %v1566_v48 = vld [vmem:[#allocation8 + $0x60] ss:$8 sps:$4 sm:$0xff]   ;;  %s1264_s26 = sshll.u32 %s1792_s8, 4  ;;  %s1265_s26 = int_to_ptr.vmem [resolvable:$true] %s1264_s26 }
  0x99   :  { %s1754_s28 = scalar_lea.vmem %s1265_s26, 256  ;;  %p1759_p13 = scmp.lt.s32.totalorder %s1265_s26, %s1265_s26 }
  0x9a   :  { %p1755_p12 = scmp.ne.s32.totalorder %s1265_s26, %s1754_s28  ;;  %p1760_p0 = scmp.lt.s32.totalorder %s1754_s28, %s1754_s28 }
  0x9b   :  { %497 = vmatpush1.bf16.msra.mxu1 %v1499_v49  ;;  %732 = vmatpush1.bf16.msra.mxu0 %v1524_v3  ;;  %v1571_v49 = vld [vmem:[#allocation8 + $0x74] ss:$8 sps:$4 sm:$0xff]  }
  0x9c   :  { %733 = vmatprep.subr.bf16.mxu0 %v1529_v4  ;;  %964 = vmatprep.subr.bf16.mxu1 %v1550_v36  ;;  %v1625_v36 = vld [vmem:[#allocation10 + $0x94] ss:$8 sps:$4 sm:$0xff]   ;;  %p1761_p1 = por %p1760_p0, %p1759_p13 }
  0x9e   :  { %p1762_p2 = pnand %p1761_p1, %p1755_p12 }
  0x9f   :  { %734 = vmatpush1.bf16.msra.mxu0 %v1527_v5 }
  0xa0   :  { %735 = vmatprep.subr.bf16.mxu0 %v1532_v6 }
  0xa3   :  { %736 = vmatpush1.bf16.msra.mxu0 %v1530_v7 }
  0xa4   :  { %737 = vmatprep.subr.bf16.mxu0 %v1535_v8 }
  0xa7   :  { %738 = vmatpush1.bf16.msra.mxu0 %v1533_v9 }
  0xa8   :  { %739 = vmatprep.subr.bf16.mxu0 %v1538_v10 }
  0xab   :  { %740 = vmatpush1.bf16.msra.mxu0 %v1536_v11 }
  0xac   :  { %741 = vmatprep.subr.bf16.mxu0 %v1541_v12  ;;  %v1592_v12 = vld [vmem:[#allocation8 + $0xe4] ss:$8 sps:$4 sm:$0xff]  }
  0xaf   :  { %742 = vmatpush1.bf16.msra.mxu0 %v1539_v13  ;;  %v1590_v13 = vld [vmem:[#allocation8 + $0xe0] ss:$8 sps:$4 sm:$0xff]  }
  0xb0   :  { %743 = vmatprep.subr.bf16.mxu0 %v1544_v31  ;;  %v1614_v31 = vld [vmem:[#allocation10 + $0x60] ss:$8 sps:$4 sm:$0xff]  }
  0xb3   :  { %744 = vmatpush1.bf16.msra.mxu0 %v1542_v32  ;;  %v1619_v32 = vld [vmem:[#allocation10 + $0x74] ss:$8 sps:$4 sm:$0xff]  }
  0xb4   :  { %745 = vmatprep.subr.bf16.mxu0 %v1547_v33  ;;  %v1617_v33 = vld [vmem:[#allocation10 + $0x70] ss:$8 sps:$4 sm:$0xff]  }
  0xb7   :  { %746 = vmatpush1.bf16.msra.mxu0 %v1545_v34  ;;  %v1622_v34 = vld [vmem:[#allocation10 + $0x84] ss:$8 sps:$4 sm:$0xff]  }
 0x14d   :  { %v251_v21 = vpop.f32.mrb[0].mxu0 }
 0x14e   :  { %v252_v22 = vadd.f32 %v251_v21, %v130_v19  ;;  %v253_v23 = vpop.f32.mrb[1].mxu0  ;;  %v1598_v19 = vld [vmem:[#allocation10 + $0x4] ss:$8 sps:$4 sm:$0xff]   ;;  %v1599_v21 = vld [vmem:[#allocation10 + $0x10] ss:$8 sps:$4 sm:$0xff]  }
 0x14f   :  { %v254_v24 = vadd.f32 %v253_v23, %v134_v20  ;;  %v255_v25 = vpop.f32.mrb[2].mxu0  ;;  %v1601_v20 = vld [vmem:[#allocation10 + $0x14] ss:$8 sps:$4 sm:$0xff]   ;;  %1213 = vmatprep.subr.bf16.mxu0 %v1598_v19  ;;  %v1602_v23 = vld [vmem:[#allocation10 + $0x20] ss:$8 sps:$4 sm:$0xff]  }
 0x150   :  { %v258_v26 = vmax.f32 %v252_v22, 0.0  ;;  %v256_v27 = vpop.f32.mrb[3].mxu0  ;;  %v1604_v22 = vld [vmem:[#allocation10 + $0x24] ss:$8 sps:$4 sm:$0xff]   ;;  %v1605_v25 = vld [vmem:[#allocation10 + $0x30] ss:$8 sps:$4 sm:$0xff]  }
 0x151   :  { %v259_v28 = vmax.f32 %v254_v24, 0.0  ;;  %v1607_v24 = vld [vmem:[#allocation10 + $0x34] ss:$8 sps:$4 sm:$0xff]   ;;  %v1608_v27 = vld [vmem:[#allocation10 + $0x40] ss:$8 sps:$4 sm:$0xff]  }
 0x152   :  { %v260_v30 = vpack.c.bf16 %v258_v26, %v258_v26  ;;  %v1610_v26 = vld [vmem:[#allocation10 + $0x44] ss:$8 sps:$4 sm:$0xff]  }
 0x153   :  { %v261_v29 = vpack.c.bf16 %v259_v28, %v259_v28  ;;  %v1613_v28 = vld [vmem:[#allocation10 + $0x54] ss:$8 sps:$4 sm:$0xff]  }
 0x155   :  { %498 = vmatprep.mubr.bf16.mxu1 %v261_v29  ;;  %v1611_v29 = vld [vmem:[#allocation10 + $0x50] ss:$8 sps:$4 sm:$0xff]  }
 0x156   :  { %499 = vmatmul.mubr.bf16.vlgmr.msra.gmra.mrb[0].mxu1 %v260_v30  ;;  %v1616_v30 = vld [vmem:[#allocation10 + $0x64] ss:$8 sps:$4 sm:$0xff]  }
 0x157   :  { %965 = vmatpush1.bf16.msra.mxu1 %v1548_v35  ;;  %v1620_v35 = vld [vmem:[#allocation10 + $0x80] ss:$8 sps:$4 sm:$0xff]  }
 0x158   :  { %966 = vmatprep.subr.bf16.mxu1 %v1553_v37  ;;  %v1623_v37 = vld [vmem:[#allocation10 + $0x90] ss:$8 sps:$4 sm:$0xff]  }
 0x15b   :  { %967 = vmatpush1.bf16.msra.mxu1 %v1551_v38  ;;  %v1628_v38 = vld [vmem:[#allocation10 + $0xa4] ss:$8 sps:$4 sm:$0xff]  }
 0x15c   :  { %968 = vmatprep.subr.bf16.mxu1 %v1556_v39  ;;  %v1626_v39 = vld [vmem:[#allocation10 + $0xa0] ss:$8 sps:$4 sm:$0xff]  }
 0x15f   :  { %969 = vmatpush1.bf16.msra.mxu1 %v1554_v40  ;;  %v1631_v40 = vld [vmem:[#allocation10 + $0xb4] ss:$8 sps:$4 sm:$0xff]  }
 0x160   :  { %970 = vmatprep.subr.bf16.mxu1 %v1559_v41  ;;  %v1629_v41 = vld [vmem:[#allocation10 + $0xb0] ss:$8 sps:$4 sm:$0xff]  }
 0x163   :  { %971 = vmatpush1.bf16.msra.mxu1 %v1557_v42  ;;  %v1634_v42 = vld [vmem:[#allocation10 + $0xc4] ss:$8 sps:$4 sm:$0xff]  }
 0x164   :  { %972 = vmatprep.subr.bf16.mxu1 %v1562_v43  ;;  %v1632_v43 = vld [vmem:[#allocation10 + $0xc0] ss:$8 sps:$4 sm:$0xff]  }
 0x167   :  { %973 = vmatpush1.bf16.msra.mxu1 %v1560_v44  ;;  %v1637_v44 = vld [vmem:[#allocation10 + $0xd4] ss:$8 sps:$4 sm:$0xff]  }
 0x168   :  { %974 = vmatprep.subr.bf16.mxu1 %v1565_v45  ;;  %v1635_v45 = vld [vmem:[#allocation10 + $0xd0] ss:$8 sps:$4 sm:$0xff]  }
 0x16b   :  { %975 = vmatpush1.bf16.msra.mxu1 %v1563_v46  ;;  %v543_v46 = vld [vmem:[%s1992_s6] sm:$0x3] }
 0x16c   :  { %976 = vmatprep.subr.bf16.mxu1 %v1568_v47  ;;  %v548_v47 = vrot.slane %v543_v46, %v1945_v16 }
 0x16f   :  { %977 = vmatpush1.bf16.msra.mxu1 %v1566_v48  ;;  %v552_v48 = vrot.slane %v543_v46, %v1950_v18 }
 0x170   :  { %978 = vmatprep.subr.bf16.mxu1 %v1571_v49 }
 0x173   :  { %979 = vmatpush1.bf16.msra.mxu1 %v1569_v50 }
 0x174   :  { %980 = vmatprep.subr.bf16.mxu1 %v1574_v51 }
 0x177   :  { %981 = vmatpush1.bf16.msra.mxu1 %v1572_v52 }
 0x178   :  { %982 = vmatprep.subr.bf16.mxu1 %v1577_v53 }
 0x17b   :  { %983 = vmatpush1.bf16.msra.mxu1 %v1575_v54 }
 0x17c   :  { %984 = vmatprep.subr.bf16.mxu1 %v1580_v55 }
 0x17f   :  { %985 = vmatpush1.bf16.msra.mxu1 %v1578_v56 }
 0x180   :  { %986 = vmatprep.subr.bf16.mxu1 %v1583_v57 }
 0x183   :  { %987 = vmatpush1.bf16.msra.mxu1 %v1581_v58 }
 0x184   :  { %988 = vmatprep.subr.bf16.mxu1 %v1586_v59  ;;  %v1640_v59 = vld [vmem:[#allocation10 + $0xe4] ss:$8 sps:$4 sm:$0xff]  }
 0x187   :  { %989 = vmatpush1.bf16.msra.mxu1 %v1584_v60  ;;  %v1638_v60 = vld [vmem:[#allocation10 + $0xe0] ss:$8 sps:$4 sm:$0xff]  }
 0x188   :  { %990 = vmatprep.subr.bf16.mxu1 %v1589_v61  ;;  %v1643_v61 = vld [vmem:[#allocation10 + $0xf4] ss:$8 sps:$4 sm:$0xff]  }
 0x18b   :  { %991 = vmatpush1.bf16.msra.mxu1 %v1587_v62  ;;  %v1641_v62 = vld [vmem:[#allocation10 + $0xf0] ss:$8 sps:$4 sm:$0xff]  }
 0x18c   :  { %992 = vmatprep.subr.bf16.mxu1 %v1592_v12  ;;  %v1041_v12 = vld [vmem:[%s1996_s10] sm:$0x3] }
 0x18f   :  { %993 = vmatpush1.bf16.msra.mxu1 %v1590_v13  ;;  %v1046_v13 = vrot.slane %v1041_v12, %v1945_v16 }
 0x190   :  { %994 = vmatprep.subr.bf16.mxu1 %v1595_v14  ;;  %v1050_v14 = vrot.slane %v1041_v12, %v1950_v18 }
 0x193   :  { %995 = vmatpush1.bf16.msra.mxu1 %v1593_v15 }
 0x229   :  { %v500_v2 = vpop.f32.mrb[0].mxu1 }
 0x22a   :  { %v501_v3 = vadd.f32 %v500_v2, %v299_v0  ;;  %v502_v4 = vpop.f32.mrb[1].mxu1  ;;  %v797_v0 = vrot.slane %v792_v63, %v1945_v16 }
 0x22b   :  { %v503_v5 = vadd.f32 %v502_v4, %v303_v1  ;;  %v504_v6 = vpop.f32.mrb[2].mxu1  ;;  %v801_v1 = vrot.slane %v792_v63, %v1950_v18 }
 0x22c   :  { %v507_v7 = vmax.f32 %v501_v3, 0.0  ;;  %v505_v8 = vpop.f32.mrb[3].mxu1 }
 0x22d   :  { %v508_v9 = vmax.f32 %v503_v5, 0.0 }
 0x22e   :  { %v509_v11 = vpack.c.bf16 %v507_v7, %v507_v7 }
 0x22f   :  { %v510_v10 = vpack.c.bf16 %v508_v9, %v508_v9 }
 0x231   :  { %747 = vmatprep.mubr.bf16.mxu0 %v510_v10 }
 0x232   :  { %748 = vmatmul.mubr.bf16.vlgmr.msra.gmra.mrb[4].mxu0 %v509_v11 }
 0x233   :  { %1214 = vmatpush1.bf16.msra.mxu0 %v1596_v17 }
 0x234   :  { %1215 = vmatprep.subr.bf16.mxu0 %v1601_v20 }
 0x237   :  { %1216 = vmatpush1.bf16.msra.mxu0 %v1599_v21 }
 0x238   :  { %1217 = vmatprep.subr.bf16.mxu0 %v1604_v22 }
 0x23b   :  { %1218 = vmatpush1.bf16.msra.mxu0 %v1602_v23 }
 0x23c   :  { %1219 = vmatprep.subr.bf16.mxu0 %v1607_v24 }
 0x23f   :  { %1220 = vmatpush1.bf16.msra.mxu0 %v1605_v25 }
 0x240   :  { %1221 = vmatprep.subr.bf16.mxu0 %v1610_v26 }
 0x243   :  { %1222 = vmatpush1.bf16.msra.mxu0 %v1608_v27 }
 0x244   :  { %1223 = vmatprep.subr.bf16.mxu0 %v1613_v28 }
 0x247   :  { %1224 = vmatpush1.bf16.msra.mxu0 %v1611_v29 }
 0x248   :  { %1225 = vmatprep.subr.bf16.mxu0 %v1616_v30 }
 0x24b   :  { %1226 = vmatpush1.bf16.msra.mxu0 %v1614_v31 }
 0x24c   :  { %1227 = vmatprep.subr.bf16.mxu0 %v1619_v32 }
 0x24f   :  { %1228 = vmatpush1.bf16.msra.mxu0 %v1617_v33 }
 0x250   :  { %1229 = vmatprep.subr.bf16.mxu0 %v1622_v34 }
 0x253   :  { %1230 = vmatpush1.bf16.msra.mxu0 %v1620_v35 }
 0x254   :  { %1231 = vmatprep.subr.bf16.mxu0 %v1625_v36 }
 0x257   :  { %1232 = vmatpush1.bf16.msra.mxu0 %v1623_v37 }
 0x258   :  { %1233 = vmatprep.subr.bf16.mxu0 %v1628_v38 }
 0x25b   :  { %1234 = vmatpush1.bf16.msra.mxu0 %v1626_v39 }
 0x25c   :  { %1235 = vmatprep.subr.bf16.mxu0 %v1631_v40 }
 0x25f   :  { %1236 = vmatpush1.bf16.msra.mxu0 %v1629_v41 }
 0x260   :  { %1237 = vmatprep.subr.bf16.mxu0 %v1634_v42 }
 0x263   :  { %1238 = vmatpush1.bf16.msra.mxu0 %v1632_v43 }
 0x264   :  { %1239 = vmatprep.subr.bf16.mxu0 %v1637_v44 }
 0x267   :  { %1240 = vmatpush1.bf16.msra.mxu0 %v1635_v45 }
 0x268   :  { %1241 = vmatprep.subr.bf16.mxu0 %v1640_v59 }
 0x26b   :  { %1242 = vmatpush1.bf16.msra.mxu0 %v1638_v60 }
 0x26c   :  { %1243 = vmatprep.subr.bf16.mxu0 %v1643_v61 }
 0x26f   :  { %1244 = vmatpush1.bf16.msra.mxu0 %v1641_v62 }
 0x305   :  { %v749_v49 = vpop.f32.mrb[4].mxu0 }
 0x306   :  { %v750_v50 = vadd.f32 %v749_v49, %v548_v47  ;;  %v751_v51 = vpop.f32.mrb[5].mxu0 }
 0x307   :  { %v752_v52 = vadd.f32 %v751_v51, %v552_v48  ;;  %v753_v53 = vpop.f32.mrb[6].mxu0 }
 0x308   :  { %v756_v54 = vmax.f32 %v750_v50, 0.0  ;;  %v754_v55 = vpop.f32.mrb[7].mxu0 }
 0x309   :  { %v757_v56 = vmax.f32 %v752_v52, 0.0 }
 0x30a   :  { %v758_v58 = vpack.c.bf16 %v756_v54, %v756_v54 }
 0x30b   :  { %v759_v57 = vpack.c.bf16 %v757_v56, %v757_v56 }
 0x30d   :  { %996 = vmatprep.mubr.bf16.mxu1 %v759_v57 }
 0x30e   :  { %997 = vmatmul.mubr.bf16.vlgmr.msra.gmra.mrb[4].mxu1 %v758_v58 }
 0x3e1   :  { %v998_v2 = vpop.f32.mrb[4].mxu1 }
 0x3e2   :  { %v999_v3 = vadd.f32 %v998_v2, %v797_v0  ;;  %v1000_v4 = vpop.f32.mrb[5].mxu1 }
 0x3e3   :  { %v1001_v5 = vadd.f32 %v1000_v4, %v801_v1  ;;  %v1002_v6 = vpop.f32.mrb[6].mxu1 }
 0x3e4   :  { %v1005_v7 = vmax.f32 %v999_v3, 0.0  ;;  %v1003_v8 = vpop.f32.mrb[7].mxu1 }
 0x3e5   :  { %v1006_v9 = vmax.f32 %v1001_v5, 0.0 }
 0x3e6   :  { %v1007_v11 = vpack.c.bf16 %v1005_v7, %v1005_v7 }
 0x3e7   :  { %v1008_v10 = vpack.c.bf16 %v1006_v9, %v1006_v9 }
 0x3e9   :  { %1245 = vmatprep.mubr.bf16.mxu0 %v1008_v10 }
 0x3ea   :  { %1246 = vmatmul.mubr.bf16.vlgmr.msra.gmra.mrb[8].mxu0 %v1007_v11 }
 0x4bd   :  { %v1247_v15 = vpop.f32.mrb[8].mxu0 }
 0x4be   :  { %v1248_v17 = vadd.f32 %v1247_v15, %v1046_v13  ;;  %v1249_v19 = vpop.f32.mrb[9].mxu0 }
 0x4bf   :  { %v1250_v20 = vadd.f32 %v1249_v19, %v1050_v14  ;;  %v1251_v21 = vpop.f32.mrb[10].mxu0 }
 0x4c0   :  { %v1254_v22 = vmax.f32 %v1248_v17, 0.0  ;;  %v1252_v23 = vpop.f32.mrb[11].mxu0 }
 0x4c1   :  { %v1255_v24 = vmax.f32 %v1250_v20, 0.0 }
 0x4c2   :  { %1256 = vst [vmem:[#allocation11] sm:$0xff] %v1254_v22 }
 0x4c3   :  { %1257 = vst [vmem:[#allocation11 + $0x8] sm:$0xff] %v1255_v24 }
 0x4c4   :  { %1765 = shalt.err (!%p1762_p2)
}
 0x4c5   :  { %s1766_s25 = scalar_lea.hbm %s1997_s11, 256 }
 0x4c6   :  { %p1767_p3 = scmp.ne.s32.totalorder %s1997_s11, %s1766_s25  ;;  %p1770_p4 = scmp.lt.u32.totalorder %s1766_s25, %s1997_s11 }
 0x4c8   :  { %p1772_p5 = pnand %p1770_p4, %p1767_p3 }
 0x4ca   :  { %1775 = shalt.err (!%p1772_p5)
}
 0x4cb   :  { %1267 = dma.vmem_to_hbm [thread:$0]  %s1265_s26, 256, %s1997_s11, [#allocation4]  }
 0x4cc   :  { %1782 = dma.done.wait [#allocation4], 256  }
 0x4cd   :  { %1783 = vsyncadd [#allocation4], 4294967040 }
 0x4ce   :  { %1271 = vsyncpa [#allocation3], 1 }
 0x4cf   :  { %1272 = vsyncpa [#allocation6], 1 }
 0x4d0   :  { %1273 = vsyncpa [#allocation9], 1 }
 0x4d1   :  { %1274 = vsyncpa [#allocation4], 1 }

</bundles_post_ra>
